<compile_context>
chip_gen: v5e
topology: v5e:2x2
jax: 0.10.0
libtpu: 0.0.40
codegen_flags: <defaults>
</compile_context>

<pallas_src>
import functools

import jax
import jax.numpy as jnp
from jax.experimental import pallas as pl
from jax.experimental.pallas import tpu as pltpu

# ---------------- config (small, consistent with the module) -----------------
HIDDEN = 32
NUM_HEADS = 4
HEAD_DIM = HIDDEN // NUM_HEADS      # 8
INTERMEDIATE = 64
SEQ = 8
NUM_LAYERS = 4
RMS_EPS = 1e-6
ROPE_THETA = 10000.0
NEG_INF = -1e30                     # finite causal-mask value (NaN-safe)


# ---------------- fused stacked-decoder kernel --------------------------------
def _stacked_decoder_kernel(*refs, eps, scale, num_heads, head_dim,
                            has_residual):
    if has_residual:
        (x_ref, res0_ref, cos_ref, sin_ref,
         ln1_ref, wqkvr_ref, wo_ref, ln2_ref, wgu_ref, wd_ref,
         hid_out_ref, res_out_ref, hc_ref, rc_ref) = refs
    else:
        (x_ref, cos_ref, sin_ref,
         ln1_ref, wqkvr_ref, wo_ref, ln2_ref, wgu_ref, wd_ref,
         hid_out_ref, res_out_ref, hc_ref, rc_ref) = refs
        res0_ref = None

    layer = pl.program_id(0)
    num_layers = pl.num_programs(0)
    seq, hidden = x_ref.shape
    inter = wgu_ref.shape[-1] // 2
    bf16 = jnp.bfloat16

    # ---- initialize the (hidden, residual) carry on the first layer ---------
    @pl.when(layer == 0)
    def _init_carry():
        hc_ref[...] = x_ref[...]
        if has_residual:
            rc_ref[...] = res0_ref[...]
        else:
            rc_ref[...] = jnp.zeros_like(rc_ref)

    def rmsnorm(x, w):
        var = jnp.mean(x * x, axis=-1, keepdims=True)
        return x * jax.lax.rsqrt(var + eps) * w

    # ---- fused residual add + input RMSNorm (f32 elementwise) ---------------
    res1 = hc_ref[...] + rc_ref[...]          # layer 0: x + 0 == x
    h1 = rmsnorm(res1, ln1_ref[0])

    # ---- ONE fused bf16 projection: [ q | k | v | rot(q) | rot(k) ] ---------
    qkvr = jnp.dot(h1.astype(bf16), wqkvr_ref[0],
                   preferred_element_type=jnp.float32)          # [S, 5H] f32

    # ---- RoPE: pure elementwise (rotate-half already folded into weights) ---
    cos = cos_ref[...]                        # [S, H] head-tiled f32 tables
    sin = sin_ref[...]
    q = qkvr[:, 0 * hidden:1 * hidden] * cos + qkvr[:, 3 * hidden:4 * hidden] * sin
    k = qkvr[:, 1 * hidden:2 * hidden] * cos + qkvr[:, 4 * hidden:5 * hidden] * sin
    v = qkvr[:, 2 * hidden:3 * hidden]

    # ---- attention: all heads in ONE batched contraction each ---------------
    def to_heads(t):                          # [S, H] -> [NH, S, HD] (leading batch)
        return jnp.stack(
            [t[:, h * head_dim:(h + 1) * head_dim] for h in range(num_heads)],
            axis=0).astype(bf16)

    q3, k3, v3 = to_heads(q), to_heads(k), to_heads(v)

    s = jnp.einsum('hqd,hkd->hqk', q3, k3,
                   preferred_element_type=jnp.float32) * scale   # [NH, S, S]
    rows = jax.lax.broadcasted_iota(jnp.int32, (seq, seq), 0)
    cols = jax.lax.broadcasted_iota(jnp.int32, (seq, seq), 1)
    s = jnp.where((cols <= rows)[None, :, :], s, NEG_INF)
    m = jnp.max(s, axis=-1, keepdims=True)
    p = jnp.exp(s - m)
    p = p / jnp.sum(p, axis=-1, keepdims=True)     # exact softmax (review note)
    o3 = jnp.einsum('hqk,hkd->hqd', p.astype(bf16), v3,
                    preferred_element_type=jnp.float32)          # [NH, S, HD]
    attn = jnp.concatenate([o3[h] for h in range(num_heads)], axis=-1)  # [S, H]

    attn_out = jnp.dot(attn.astype(bf16), wo_ref[0],
                       preferred_element_type=jnp.float32)

    # ---- fused residual add + post-attention RMSNorm ------------------------
    res2 = attn_out + res1
    h2 = rmsnorm(res2, ln2_ref[0])

    # ---- MLP: fused gate|up matmul, SiLU*up, down projection ----------------
    gu = jnp.dot(h2.astype(bf16), wgu_ref[0],
                 preferred_element_type=jnp.float32)             # [S, 2I]
    gate = gu[:, :inter]
    up = gu[:, inter:]
    act = gate * jax.lax.logistic(gate) * up
    new_hidden = jnp.dot(act.astype(bf16), wd_ref[0],
                         preferred_element_type=jnp.float32)

    # ---- update carries; emit stack outputs on the last layer ---------------
    hc_ref[...] = new_hidden
    rc_ref[...] = res2

    @pl.when(layer == num_layers - 1)
    def _finalize():
        hid_out_ref[...] = new_hidden
        res_out_ref[...] = res2


# ---------------- rotary tables (hoisted, shared by all layers) ---------------
def rope_tables(positions, head_dim=HEAD_DIM, num_heads=NUM_HEADS,
                theta=ROPE_THETA):
    inv_freq = 1.0 / (theta ** (
        jnp.arange(0, head_dim, 2, dtype=jnp.float32) / head_dim))
    ang = positions.astype(jnp.float32)[:, None] * inv_freq[None, :]
    cos = jnp.cos(ang)
    sin = jnp.sin(ang)
    cos_full = jnp.concatenate([cos, cos], axis=-1)       # [S, HD]
    sin_full = jnp.concatenate([sin, sin], axis=-1)
    # head-tiled full-width tables -> in-kernel RoPE is lane-dense elementwise
    return jnp.tile(cos_full, (1, num_heads)), jnp.tile(sin_full, (1, num_heads))


def _fold_rotate_half_cols(w):
    """Return w' such that (x @ w') == rotate_half(x @ w), per head (exact)."""
    c = w.shape[0]
    half = HEAD_DIM // 2
    w3 = w.reshape(c, NUM_HEADS, HEAD_DIM)
    w_rot = jnp.concatenate([-w3[..., half:], w3[..., :half]], axis=-1)
    return w_rot.reshape(c, NUM_HEADS * HEAD_DIM)


# ---------------- stacked decoder forward (single pallas_call) ----------------
def _cost_estimate(num_layers, s, h, inter, nh, hd):
    proj = 2 * s * h * (5 * h)
    qk = 2 * nh * s * s * hd
    pv = 2 * nh * s * s * hd
    oprj = 2 * s * h * h
    gup = 2 * s * h * (2 * inter)
    down = 2 * s * inter * h
    flops = num_layers * (proj + qk + pv + oprj + gup + down)
    trans = num_layers * (nh * s * s + s * inter)
    w_bytes = num_layers * (2 * (h * 5 * h + h * h + h * 2 * inter + inter * h)
                            + 4 * 2 * h)
    io_bytes = 4 * s * h * 6
    return pl.CostEstimate(flops=flops, transcendentals=trans,
                           bytes_accessed=w_bytes + io_bytes)


def baichuan_layer_stack(params, cos_t, sin_t, hidden_states, residual=None):
    S, H = hidden_states.shape
    L = params["w_qkvr"].shape[0]
    has_residual = residual is not None

    kernel = functools.partial(
        _stacked_decoder_kernel,
        eps=RMS_EPS,
        scale=HEAD_DIM ** -0.5,
        num_heads=NUM_HEADS,
        head_dim=HEAD_DIM,
        has_residual=has_residual,
    )

    in_specs = [pl.BlockSpec((S, H), lambda l: (0, 0))]              # x
    inputs = [hidden_states]
    if has_residual:
        in_specs.append(pl.BlockSpec((S, H), lambda l: (0, 0)))      # residual
        inputs.append(residual)
    in_specs += [
        pl.BlockSpec((S, H), lambda l: (0, 0)),                      # cos
        pl.BlockSpec((S, H), lambda l: (0, 0)),                      # sin
        pl.BlockSpec((1, 1, H), lambda l: (l, 0, 0)),                # ln1
        pl.BlockSpec((1, H, 5 * H), lambda l: (l, 0, 0)),            # w_qkvr
        pl.BlockSpec((1, H, H), lambda l: (l, 0, 0)),                # w_o
        pl.BlockSpec((1, 1, H), lambda l: (l, 0, 0)),                # ln2
        pl.BlockSpec((1, H, 2 * INTERMEDIATE), lambda l: (l, 0, 0)), # w_gu
        pl.BlockSpec((1, INTERMEDIATE, H), lambda l: (l, 0, 0)),     # w_d
    ]
    inputs += [cos_t, sin_t, params["ln1"], params["w_qkvr"], params["w_o"],
               params["ln2"], params["w_gu"], params["w_d"]]

    out, new_residual = pl.pallas_call(
        kernel,
        out_shape=(jax.ShapeDtypeStruct((S, H), jnp.float32),
                   jax.ShapeDtypeStruct((S, H), jnp.float32)),
        grid_spec=pltpu.PrefetchScalarGridSpec(
            num_scalar_prefetch=0,
            grid=(L,),
            in_specs=in_specs,
            out_specs=[pl.BlockSpec((S, H), lambda l: (0, 0)),
                       pl.BlockSpec((S, H), lambda l: (0, 0))],
            scratch_shapes=[pltpu.VMEM((S, H), jnp.float32),   # hidden carry
                            pltpu.VMEM((S, H), jnp.float32)],  # residual carry
        ),
        compiler_params=pltpu.CompilerParams(
            dimension_semantics=("arbitrary",),      # layers are sequential
            vmem_limit_bytes=32 * 1024 * 1024),
        cost_estimate=_cost_estimate(L, S, H, INTERMEDIATE, NUM_HEADS, HEAD_DIM),
    )(*inputs)
    return out, new_residual


# ---------------- parameters (deterministic, synthetic, bf16 weights) ---------
def init_params(key, num_layers):
    keys = jax.random.split(key, num_layers)
    s = 0.02
    qkvr_l, wo_l, gu_l, wd_l, ln1_l, ln2_l = [], [], [], [], [], []
    for i in range(num_layers):
        k0, k1, k2, k3 = jax.random.split(keys[i], 4)
        w_pack = jax.random.normal(k0, (HIDDEN, 3 * HIDDEN), jnp.float32) * s
        w_q = w_pack[:, :HIDDEN]
        w_k = w_pack[:, HIDDEN:2 * HIDDEN]
        w_v = w_pack[:, 2 * HIDDEN:]
        # rotate-half folded into extra projection columns (exact; init-time only)
        w_qkvr = jnp.concatenate(
            [w_q, w_k, w_v, _fold_rotate_half_cols(w_q),
             _fold_rotate_half_cols(w_k)], axis=1)               # [H, 5H]
        qkvr_l.append(w_qkvr)
        wo_l.append(jax.random.normal(k1, (HIDDEN, HIDDEN), jnp.float32) * s)
        gu_l.append(jax.random.normal(k2, (HIDDEN, 2 * INTERMEDIATE),
                                      jnp.float32) * s)
        wd_l.append(jax.random.normal(k3, (INTERMEDIATE, HIDDEN),
                                      jnp.float32) * s)
        ln1_l.append(jnp.ones((1, HIDDEN), jnp.float32))
        ln2_l.append(jnp.ones((1, HIDDEN), jnp.float32))
    return dict(
        ln1=jnp.stack(ln1_l),                                   # [L, 1, H] f32
        ln2=jnp.stack(ln2_l),
        w_qkvr=jnp.stack(qkvr_l).astype(jnp.bfloat16),          # [L, H, 5H]
        w_o=jnp.stack(wo_l).astype(jnp.bfloat16),               # [L, H, H]
        w_gu=jnp.stack(gu_l).astype(jnp.bfloat16),              # [L, H, 2I]
        w_d=jnp.stack(wd_l).astype(jnp.bfloat16),               # [L, I, H]
    )


# ---------------- pure-JAX reference (for a loose numerical sanity check) -----
def reference_stack(params, cos_t, sin_t, x, residual=None):
    L = params["w_qkvr"].shape[0]
    half = HEAD_DIM // 2

    def rmsnorm(v, w):
        return v * jax.lax.rsqrt(jnp.mean(v * v, -1, keepdims=True) + RMS_EPS) * w

    hidden = x
    for l in range(L):
        wq = params["w_qkvr"][l, :, :HIDDEN].astype(jnp.float32)
        wk = params["w_qkvr"][l, :, HIDDEN:2 * HIDDEN].astype(jnp.float32)
        wv = params["w_qkvr"][l, :, 2 * HIDDEN:3 * HIDDEN].astype(jnp.float32)
        wo = params["w_o"][l].astype(jnp.float32)
        wgu = params["w_gu"][l].astype(jnp.float32)
        wd = params["w_d"][l].astype(jnp.float32)
        ln1, ln2 = params["ln1"][l], params["ln2"][l]

        residual = hidden if residual is None else hidden + residual
        h = rmsnorm(residual, ln1)
        q, k, v = h @ wq, h @ wk, h @ wv

        def rope(t):
            t3 = t.reshape(SEQ, NUM_HEADS, HEAD_DIM)
            rot = jnp.concatenate([-t3[..., half:], t3[..., :half]], axis=-1)
            return t * cos_t + rot.reshape(SEQ, HIDDEN) * sin_t

        q, k = rope(q), rope(k)
        q3 = q.reshape(SEQ, NUM_HEADS, HEAD_DIM)
        k3 = k.reshape(SEQ, NUM_HEADS, HEAD_DIM)
        v3 = v.reshape(SEQ, NUM_HEADS, HEAD_DIM)
        s = jnp.einsum('qhd,khd->hqk', q3, k3) * (HEAD_DIM ** -0.5)
        mask = jnp.tril(jnp.ones((SEQ, SEQ), bool))
        s = jnp.where(mask[None], s, -jnp.inf)
        p = jax.nn.softmax(s, axis=-1)
        attn = jnp.einsum('hqk,khd->qhd', p, v3).reshape(SEQ, HIDDEN)
        attn_out = attn @ wo
        residual = attn_out + residual
        h2 = rmsnorm(residual, ln2)
        gu = h2 @ wgu
        act = jax.nn.silu(gu[:, :INTERMEDIATE]) * gu[:, INTERMEDIATE:]
        hidden = act @ wd
    return hidden, residual


# ---------------- main ---------------------------------------------------------
if __name__ == "__main__":
    key = jax.random.PRNGKey(0)
    pkey, xkey = jax.random.split(key)
    params = init_params(pkey, NUM_LAYERS)

    positions = jnp.arange(SEQ, dtype=jnp.int32)
    cos_t, sin_t = rope_tables(positions)                 # [S, H] each, shared
    hidden_states = jax.random.normal(xkey, (SEQ, HIDDEN), jnp.float32)

    # First stack call: residual is None (layer-0 path handled in-kernel).
    out, residual = baichuan_layer_stack(params, cos_t, sin_t, hidden_states,
                                         residual=None)
    # Second call exercises the explicit-residual input path (deeper stack).
    out2, residual2 = baichuan_layer_stack(params, cos_t, sin_t, out,
                                           residual=residual)
    jax.block_until_ready((out, residual, out2, residual2))

    assert out.shape == (SEQ, HIDDEN) and residual.shape == (SEQ, HIDDEN)
    assert out2.shape == (SEQ, HIDDEN) and residual2.shape == (SEQ, HIDDEN)
    assert jnp.all(jnp.isfinite(out)) and jnp.all(jnp.isfinite(out2))

    # Loose sanity check vs a pure-JAX reference (bf16 weights, f32 activations).
    ref_out, ref_res = reference_stack(params, cos_t, sin_t, hidden_states, None)
    assert float(jnp.max(jnp.abs(out - ref_out))) < 2e-2
    assert float(jnp.max(jnp.abs(residual - ref_res))) < 2e-2

    print("KERNEL_OK")
</pallas_src>

<mosaic_0001>
module attributes {stable_mosaic.version = 11 : i64} {
  func.func @_stacked_decoder_kernel(%arg0: i32, %arg1: memref<8x32xf32, #tpu.memory_space<vmem>>, %arg2: memref<8x32xf32, #tpu.memory_space<vmem>>, %arg3: memref<8x32xf32, #tpu.memory_space<vmem>>, %arg4: memref<1x1x32xf32, #tpu.memory_space<vmem>>, %arg5: memref<1x32x160xbf16, #tpu.memory_space<vmem>>, %arg6: memref<1x32x32xbf16, #tpu.memory_space<vmem>>, %arg7: memref<1x1x32xf32, #tpu.memory_space<vmem>>, %arg8: memref<1x32x128xbf16, #tpu.memory_space<vmem>>, %arg9: memref<1x64x32xbf16, #tpu.memory_space<vmem>>, %arg10: memref<8x32xf32, #tpu.memory_space<vmem>>, %arg11: memref<8x32xf32, #tpu.memory_space<vmem>>, %arg12: memref<8x32xf32, #tpu.memory_space<vmem>>, %arg13: memref<8x32xf32, #tpu.memory_space<vmem>>) attributes {dimension_semantics = [#tpu.dimension_semantics<arbitrary>], iteration_bounds = array<i64: 4>, scalar_prefetch = 0 : i64, scratch_operands = 2 : i64, tpu.core_type = #tpu.core_type<tc>, window_params = [{pipeline_mode = #tpu.pipeline_mode<synchronous>, transform_indices = @transform_0, window_bounds = array<i64: 8, 32>}, {pipeline_mode = #tpu.pipeline_mode<synchronous>, transform_indices = @transform_1, window_bounds = array<i64: 8, 32>}, {pipeline_mode = #tpu.pipeline_mode<synchronous>, transform_indices = @transform_2, window_bounds = array<i64: 8, 32>}, {transform_indices = @transform_3, window_bounds = array<i64: 1, 1, 32>}, {transform_indices = @transform_4, window_bounds = array<i64: 1, 32, 160>}, {transform_indices = @transform_5, window_bounds = array<i64: 1, 32, 32>}, {transform_indices = @transform_6, window_bounds = array<i64: 1, 1, 32>}, {transform_indices = @transform_7, window_bounds = array<i64: 1, 32, 128>}, {transform_indices = @transform_8, window_bounds = array<i64: 1, 64, 32>}, {pipeline_mode = #tpu.pipeline_mode<synchronous>, transform_indices = @transform_9, window_bounds = array<i64: 8, 32>}, {pipeline_mode = #tpu.pipeline_mode<synchronous>, transform_indices = @transform_10, window_bounds = array<i64: 8, 32>}]} {
    %c0_i32 = arith.constant 0 : i32
    %0 = arith.cmpi eq, %arg0, %c0_i32 : i32
    %1 = arith.extui %0 : i1 to i32
    %c0_i32_0 = arith.constant 0 : i32
    %2 = arith.cmpi ne, %1, %c0_i32_0 : i32
    scf.if %2 {
      %c0_47 = arith.constant 0 : index
      %c0_48 = arith.constant 0 : index
      %139 = vector.load %arg1[%c0_47, %c0_48] : memref<8x32xf32, #tpu.memory_space<vmem>>, vector<8x32xf32>
      %c0_49 = arith.constant 0 : index
      %c0_50 = arith.constant 0 : index
      %140 = vector.load %arg12[%c0_49, %c0_50] : memref<8x32xf32, #tpu.memory_space<vmem>>, vector<8x32xf32>
      tpu.vector_store %arg12[%c0_49, %c0_50], %139 {strides = array<i32>} : memref<8x32xf32, #tpu.memory_space<vmem>>, vector<8x32xf32>,
      %cst_51 = arith.constant 0.000000e+00 : f32
      %141 = vector.broadcast %cst_51 : f32 to vector<8x32xf32>
      %c0_52 = arith.constant 0 : index
      %c0_53 = arith.constant 0 : index
      %142 = vector.load %arg13[%c0_52, %c0_53] : memref<8x32xf32, #tpu.memory_space<vmem>>, vector<8x32xf32>
      tpu.vector_store %arg13[%c0_52, %c0_53], %141 {strides = array<i32>} : memref<8x32xf32, #tpu.memory_space<vmem>>, vector<8x32xf32>,
    } else {
    }
    %c0 = arith.constant 0 : index
    %c0_1 = arith.constant 0 : index
    %3 = vector.load %arg12[%c0, %c0_1] : memref<8x32xf32, #tpu.memory_space<vmem>>, vector<8x32xf32>
    %c0_2 = arith.constant 0 : index
    %c0_3 = arith.constant 0 : index
    %4 = vector.load %arg13[%c0_2, %c0_3] : memref<8x32xf32, #tpu.memory_space<vmem>>, vector<8x32xf32>
    %5 = arith.addf %3, %4 : vector<8x32xf32>
    %c0_4 = arith.constant 0 : index
    %c0_5 = arith.constant 0 : index
    %c0_6 = arith.constant 0 : index
    %6 = vector.load %arg4[%c0_4, %c0_5, %c0_6] : memref<1x1x32xf32, #tpu.memory_space<vmem>>, vector<1x1x32xf32>
    %7 = vector.shape_cast %6 : vector<1x1x32xf32> to vector<1x32xf32>
    %8 = arith.mulf %5, %5 : vector<8x32xf32>
    %cst = arith.constant dense<0.000000e+00> : vector<8xf32>
    %9 = vector.multi_reduction <add>, %8, %cst [1] : vector<8x32xf32> to vector<8xf32>
    %10 = vector.shape_cast %9 : vector<8xf32> to vector<8x1xf32>
    %cst_7 = arith.constant 3.200000e+01 : f32
    %11 = vector.broadcast %cst_7 : f32 to vector<8x1xf32>
    %12 = arith.divf %10, %11 : vector<8x1xf32>
    %cst_8 = arith.constant 9.99999997E-7 : f32
    %13 = vector.broadcast %cst_8 : f32 to vector<8x1xf32>
    %14 = arith.addf %12, %13 : vector<8x1xf32>
    %15 = math.rsqrt %14 : vector<8x1xf32>
    %16 = vector.broadcast %15 : vector<8x1xf32> to vector<8x32xf32>
    %17 = arith.mulf %5, %16 : vector<8x32xf32>
    %18 = vector.broadcast %7 : vector<1x32xf32> to vector<8x32xf32>
    %19 = arith.mulf %17, %18 : vector<8x32xf32>
    %20 = arith.truncf %19 : vector<8x32xf32> to vector<8x32xbf16>
    %c0_9 = arith.constant 0 : index
    %c0_10 = arith.constant 0 : index
    %c0_11 = arith.constant 0 : index
    %21 = vector.load %arg5[%c0_9, %c0_10, %c0_11] : memref<1x32x160xbf16, #tpu.memory_space<vmem>>, vector<1x32x160xbf16>
    %22 = vector.shape_cast %21 : vector<1x32x160xbf16> to vector<32x160xbf16>
    %cst_12 = arith.constant dense<0.000000e+00> : vector<8x160xf32>
    %23 = tpu.matmul %20, %22, %cst_12 {dimension_numbers = #tpu.dot_dimension_numbers<[1], [0], [0], [1], [0, 0, 1, 1], [], []>} : vector<8x32xbf16>, vector<32x160xbf16>, vector<8x160xf32> -> vector<8x160xf32>
    %c0_13 = arith.constant 0 : index
    %c0_14 = arith.constant 0 : index
    %24 = vector.load %arg2[%c0_13, %c0_14] : memref<8x32xf32, #tpu.memory_space<vmem>>, vector<8x32xf32>
    %c0_15 = arith.constant 0 : index
    %c0_16 = arith.constant 0 : index
    %25 = vector.load %arg3[%c0_15, %c0_16] : memref<8x32xf32, #tpu.memory_space<vmem>>, vector<8x32xf32>
    %26 = vector.extract_strided_slice %23 {offsets = [0, 0], sizes = [8, 32], strides = [1, 1]} : vector<8x160xf32> to vector<8x32xf32>
    %27 = arith.mulf %26, %24 : vector<8x32xf32>
    %28 = vector.extract_strided_slice %23 {offsets = [0, 96], sizes = [8, 32], strides = [1, 1]} : vector<8x160xf32> to vector<8x32xf32>
    %29 = arith.mulf %28, %25 : vector<8x32xf32>
    %30 = arith.addf %27, %29 : vector<8x32xf32>
    %31 = vector.extract_strided_slice %23 {offsets = [0, 32], sizes = [8, 32], strides = [1, 1]} : vector<8x160xf32> to vector<8x32xf32>
    %32 = arith.mulf %31, %24 : vector<8x32xf32>
    %33 = vector.extract_strided_slice %23 {offsets = [0, 128], sizes = [8, 32], strides = [1, 1]} : vector<8x160xf32> to vector<8x32xf32>
    %34 = arith.mulf %33, %25 : vector<8x32xf32>
    %35 = arith.addf %32, %34 : vector<8x32xf32>
    %36 = vector.extract_strided_slice %23 {offsets = [0, 64], sizes = [8, 32], strides = [1, 1]} : vector<8x160xf32> to vector<8x32xf32>
    %37 = vector.extract_strided_slice %30 {offsets = [0, 0], sizes = [8, 8], strides = [1, 1]} : vector<8x32xf32> to vector<8x8xf32>
    %38 = vector.extract_strided_slice %30 {offsets = [0, 8], sizes = [8, 8], strides = [1, 1]} : vector<8x32xf32> to vector<8x8xf32>
    %39 = vector.extract_strided_slice %30 {offsets = [0, 16], sizes = [8, 8], strides = [1, 1]} : vector<8x32xf32> to vector<8x8xf32>
    %40 = vector.extract_strided_slice %30 {offsets = [0, 24], sizes = [8, 8], strides = [1, 1]} : vector<8x32xf32> to vector<8x8xf32>
    %41 = vector.shape_cast %37 : vector<8x8xf32> to vector<1x8x8xf32>
    %42 = vector.shape_cast %38 : vector<8x8xf32> to vector<1x8x8xf32>
    %43 = vector.shape_cast %39 : vector<8x8xf32> to vector<1x8x8xf32>
    %44 = vector.shape_cast %40 : vector<8x8xf32> to vector<1x8x8xf32>
    %45 = tpu.concatenate %41, %42, %43, %44 in 0 : vector<1x8x8xf32>, vector<1x8x8xf32>, vector<1x8x8xf32>, vector<1x8x8xf32> -> vector<4x8x8xf32>
    %46 = arith.truncf %45 : vector<4x8x8xf32> to vector<4x8x8xbf16>
    %47 = vector.extract_strided_slice %35 {offsets = [0, 0], sizes = [8, 8], strides = [1, 1]} : vector<8x32xf32> to vector<8x8xf32>
    %48 = vector.extract_strided_slice %35 {offsets = [0, 8], sizes = [8, 8], strides = [1, 1]} : vector<8x32xf32> to vector<8x8xf32>
    %49 = vector.extract_strided_slice %35 {offsets = [0, 16], sizes = [8, 8], strides = [1, 1]} : vector<8x32xf32> to vector<8x8xf32>
    %50 = vector.extract_strided_slice %35 {offsets = [0, 24], sizes = [8, 8], strides = [1, 1]} : vector<8x32xf32> to vector<8x8xf32>
    %51 = vector.shape_cast %47 : vector<8x8xf32> to vector<1x8x8xf32>
    %52 = vector.shape_cast %48 : vector<8x8xf32> to vector<1x8x8xf32>
    %53 = vector.shape_cast %49 : vector<8x8xf32> to vector<1x8x8xf32>
    %54 = vector.shape_cast %50 : vector<8x8xf32> to vector<1x8x8xf32>
    %55 = tpu.concatenate %51, %52, %53, %54 in 0 : vector<1x8x8xf32>, vector<1x8x8xf32>, vector<1x8x8xf32>, vector<1x8x8xf32> -> vector<4x8x8xf32>
    %56 = arith.truncf %55 : vector<4x8x8xf32> to vector<4x8x8xbf16>
    %57 = vector.extract_strided_slice %36 {offsets = [0, 0], sizes = [8, 8], strides = [1, 1]} : vector<8x32xf32> to vector<8x8xf32>
    %58 = vector.extract_strided_slice %36 {offsets = [0, 8], sizes = [8, 8], strides = [1, 1]} : vector<8x32xf32> to vector<8x8xf32>
    %59 = vector.extract_strided_slice %36 {offsets = [0, 16], sizes = [8, 8], strides = [1, 1]} : vector<8x32xf32> to vector<8x8xf32>
    %60 = vector.extract_strided_slice %36 {offsets = [0, 24], sizes = [8, 8], strides = [1, 1]} : vector<8x32xf32> to vector<8x8xf32>
    %61 = vector.shape_cast %57 : vector<8x8xf32> to vector<1x8x8xf32>
    %62 = vector.shape_cast %58 : vector<8x8xf32> to vector<1x8x8xf32>
    %63 = vector.shape_cast %59 : vector<8x8xf32> to vector<1x8x8xf32>
    %64 = vector.shape_cast %60 : vector<8x8xf32> to vector<1x8x8xf32>
    %65 = tpu.concatenate %61, %62, %63, %64 in 0 : vector<1x8x8xf32>, vector<1x8x8xf32>, vector<1x8x8xf32>, vector<1x8x8xf32> -> vector<4x8x8xf32>
    %66 = arith.truncf %65 : vector<4x8x8xf32> to vector<4x8x8xbf16>
    "tpu.trace_start"() <{level = 10 : i32, message = "hqd,hkd->hqk"}> : () -> ()
    %cst_17 = arith.constant dense<0.000000e+00> : vector<4x8x8xf32>
    %67 = tpu.matmul %46, %56, %cst_17 {dimension_numbers = #tpu.dot_dimension_numbers<[2], [2], [1], [1], [0, 0, 0, 1, 1, 1], [0], [0]>} : vector<4x8x8xbf16>, vector<4x8x8xbf16>, vector<4x8x8xf32> -> vector<4x8x8xf32>
    "tpu.trace_stop"() : () -> ()
    %cst_18 = arith.constant 0.353553385 : f32
    %68 = vector.broadcast %cst_18 : f32 to vector<4x8x8xf32>
    %69 = arith.mulf %67, %68 : vector<4x8x8xf32>
    %70 = tpu.iota {dimensions = array<i32: 0>} : vector<8x8xi32>
    %71 = tpu.iota {dimensions = array<i32: 1>} : vector<8x8xi32>
    %72 = arith.cmpi sle, %71, %70 : vector<8x8xi32>
    %73 = vector.shape_cast %72 : vector<8x8xi1> to vector<1x8x8xi1>
    %cst_19 = arith.constant -1.000000e+30 : f32
    %74 = vector.shape_cast %73 : vector<1x8x8xi1> to vector<1x8x8xi1>
    %75 = vector.broadcast %74 : vector<1x8x8xi1> to vector<4x8x8xi1>
    %76 = vector.broadcast %cst_19 : f32 to vector<4x8x8xf32>
    %77 = arith.select %75, %69, %76 : vector<4x8x8xi1>, vector<4x8x8xf32>
    %cst_20 = arith.constant dense<0xFF800000> : vector<4x8xf32>
    %78 = vector.multi_reduction <maximumf>, %77, %cst_20 [2] : vector<4x8x8xf32> to vector<4x8xf32>
    %79 = vector.shape_cast %78 : vector<4x8xf32> to vector<4x8x1xf32>
    %80 = vector.broadcast %79 : vector<4x8x1xf32> to vector<4x8x8xf32>
    %81 = arith.subf %77, %80 : vector<4x8x8xf32>
    %82 = math.exp %81 : vector<4x8x8xf32>
    %cst_21 = arith.constant dense<0.000000e+00> : vector<4x8xf32>
    %83 = vector.multi_reduction <add>, %82, %cst_21 [2] : vector<4x8x8xf32> to vector<4x8xf32>
    %84 = vector.shape_cast %83 : vector<4x8xf32> to vector<4x8x1xf32>
    %85 = vector.broadcast %84 : vector<4x8x1xf32> to vector<4x8x8xf32>
    %86 = arith.divf %82, %85 : vector<4x8x8xf32>
    %87 = arith.truncf %86 : vector<4x8x8xf32> to vector<4x8x8xbf16>
    "tpu.trace_start"() <{level = 10 : i32, message = "hqk,hkd->hqd"}> : () -> ()
    %cst_22 = arith.constant dense<0.000000e+00> : vector<4x8x8xf32>
    %88 = tpu.matmul %87, %66, %cst_22 {dimension_numbers = #tpu.dot_dimension_numbers<[2], [1], [1], [2], [0, 0, 0, 1, 1, 2], [0], [0]>} : vector<4x8x8xbf16>, vector<4x8x8xbf16>, vector<4x8x8xf32> -> vector<4x8x8xf32>
    "tpu.trace_stop"() : () -> ()
    %89 = vector.extract_strided_slice %88 {offsets = [0, 0, 0], sizes = [1, 8, 8], strides = [1, 1, 1]} : vector<4x8x8xf32> to vector<1x8x8xf32>
    %90 = vector.shape_cast %89 : vector<1x8x8xf32> to vector<8x8xf32>
    %91 = vector.extract_strided_slice %88 {offsets = [1, 0, 0], sizes = [1, 8, 8], strides = [1, 1, 1]} : vector<4x8x8xf32> to vector<1x8x8xf32>
    %92 = vector.shape_cast %91 : vector<1x8x8xf32> to vector<8x8xf32>
    %93 = vector.extract_strided_slice %88 {offsets = [2, 0, 0], sizes = [1, 8, 8], strides = [1, 1, 1]} : vector<4x8x8xf32> to vector<1x8x8xf32>
    %94 = vector.shape_cast %93 : vector<1x8x8xf32> to vector<8x8xf32>
    %95 = vector.extract_strided_slice %88 {offsets = [3, 0, 0], sizes = [1, 8, 8], strides = [1, 1, 1]} : vector<4x8x8xf32> to vector<1x8x8xf32>
    %96 = vector.shape_cast %95 : vector<1x8x8xf32> to vector<8x8xf32>
    %97 = tpu.concatenate %90, %92, %94, %96 in 1 : vector<8x8xf32>, vector<8x8xf32>, vector<8x8xf32>, vector<8x8xf32> -> vector<8x32xf32>
    %98 = arith.truncf %97 : vector<8x32xf32> to vector<8x32xbf16>
    %c0_23 = arith.constant 0 : index
    %c0_24 = arith.constant 0 : index
    %c0_25 = arith.constant 0 : index
    %99 = vector.load %arg6[%c0_23, %c0_24, %c0_25] : memref<1x32x32xbf16, #tpu.memory_space<vmem>>, vector<1x32x32xbf16>
    %100 = vector.shape_cast %99 : vector<1x32x32xbf16> to vector<32x32xbf16>
    %cst_26 = arith.constant dense<0.000000e+00> : vector<8x32xf32>
    %101 = tpu.matmul %98, %100, %cst_26 {dimension_numbers = #tpu.dot_dimension_numbers<[1], [0], [0], [1], [0, 0, 1, 1], [], []>} : vector<8x32xbf16>, vector<32x32xbf16>, vector<8x32xf32> -> vector<8x32xf32>
    %102 = arith.addf %101, %5 : vector<8x32xf32>
    %c0_27 = arith.constant 0 : index
    %c0_28 = arith.constant 0 : index
    %c0_29 = arith.constant 0 : index
    %103 = vector.load %arg7[%c0_27, %c0_28, %c0_29] : memref<1x1x32xf32, #tpu.memory_space<vmem>>, vector<1x1x32xf32>
    %104 = vector.shape_cast %103 : vector<1x1x32xf32> to vector<1x32xf32>
    %105 = arith.mulf %102, %102 : vector<8x32xf32>
    %cst_30 = arith.constant dense<0.000000e+00> : vector<8xf32>
    %106 = vector.multi_reduction <add>, %105, %cst_30 [1] : vector<8x32xf32> to vector<8xf32>
    %107 = vector.shape_cast %106 : vector<8xf32> to vector<8x1xf32>
    %cst_31 = arith.constant 3.200000e+01 : f32
    %108 = vector.broadcast %cst_31 : f32 to vector<8x1xf32>
    %109 = arith.divf %107, %108 : vector<8x1xf32>
    %cst_32 = arith.constant 9.99999997E-7 : f32
    %110 = vector.broadcast %cst_32 : f32 to vector<8x1xf32>
    %111 = arith.addf %109, %110 : vector<8x1xf32>
    %112 = math.rsqrt %111 : vector<8x1xf32>
    %113 = vector.broadcast %112 : vector<8x1xf32> to vector<8x32xf32>
    %114 = arith.mulf %102, %113 : vector<8x32xf32>
    %115 = vector.broadcast %104 : vector<1x32xf32> to vector<8x32xf32>
    %116 = arith.mulf %114, %115 : vector<8x32xf32>
    %117 = arith.truncf %116 : vector<8x32xf32> to vector<8x32xbf16>
    %c0_33 = arith.constant 0 : index
    %c0_34 = arith.constant 0 : index
    %c0_35 = arith.constant 0 : index
    %118 = vector.load %arg8[%c0_33, %c0_34, %c0_35] : memref<1x32x128xbf16, #tpu.memory_space<vmem>>, vector<1x32x128xbf16>
    %119 = vector.shape_cast %118 : vector<1x32x128xbf16> to vector<32x128xbf16>
    %cst_36 = arith.constant dense<0.000000e+00> : vector<8x128xf32>
    %120 = tpu.matmul %117, %119, %cst_36 {dimension_numbers = #tpu.dot_dimension_numbers<[1], [0], [0], [1], [0, 0, 1, 1], [], []>} : vector<8x32xbf16>, vector<32x128xbf16>, vector<8x128xf32> -> vector<8x128xf32>
    %121 = vector.extract_strided_slice %120 {offsets = [0, 0], sizes = [8, 64], strides = [1, 1]} : vector<8x128xf32> to vector<8x64xf32>
    %122 = vector.extract_strided_slice %120 {offsets = [0, 64], sizes = [8, 64], strides = [1, 1]} : vector<8x128xf32> to vector<8x64xf32>
    %123 = arith.negf %121 : vector<8x64xf32>
    %124 = math.exp %123 : vector<8x64xf32>
    %cst_37 = arith.constant 1.000000e+00 : f32
    %125 = vector.broadcast %cst_37 : f32 to vector<8x64xf32>
    %126 = arith.addf %125, %124 : vector<8x64xf32>
    %127 = arith.divf %125, %126 : vector<8x64xf32>
    %128 = arith.mulf %121, %127 : vector<8x64xf32>
    %129 = arith.mulf %128, %122 : vector<8x64xf32>
    %130 = arith.truncf %129 : vector<8x64xf32> to vector<8x64xbf16>
    %c0_38 = arith.constant 0 : index
    %c0_39 = arith.constant 0 : index
    %c0_40 = arith.constant 0 : index
    %131 = vector.load %arg9[%c0_38, %c0_39, %c0_40] : memref<1x64x32xbf16, #tpu.memory_space<vmem>>, vector<1x64x32xbf16>
    %132 = vector.shape_cast %131 : vector<1x64x32xbf16> to vector<64x32xbf16>
    %cst_41 = arith.constant dense<0.000000e+00> : vector<8x32xf32>
    %133 = tpu.matmul %130, %132, %cst_41 {dimension_numbers = #tpu.dot_dimension_numbers<[1], [0], [0], [1], [0, 0, 1, 1], [], []>} : vector<8x64xbf16>, vector<64x32xbf16>, vector<8x32xf32> -> vector<8x32xf32>
    %c0_42 = arith.constant 0 : index
    %c0_43 = arith.constant 0 : index
    %134 = vector.load %arg12[%c0_42, %c0_43] : memref<8x32xf32, #tpu.memory_space<vmem>>, vector<8x32xf32>
    tpu.vector_store %arg12[%c0_42, %c0_43], %133 {strides = array<i32>} : memref<8x32xf32, #tpu.memory_space<vmem>>, vector<8x32xf32>,
    %c0_44 = arith.constant 0 : index
    %c0_45 = arith.constant 0 : index
    %135 = vector.load %arg13[%c0_44, %c0_45] : memref<8x32xf32, #tpu.memory_space<vmem>>, vector<8x32xf32>
    tpu.vector_store %arg13[%c0_44, %c0_45], %102 {strides = array<i32>} : memref<8x32xf32, #tpu.memory_space<vmem>>, vector<8x32xf32>,
    %c3_i32 = arith.constant 3 : i32
    %136 = arith.cmpi eq, %arg0, %c3_i32 : i32
    %137 = arith.extui %136 : i1 to i32
    %c0_i32_46 = arith.constant 0 : i32
    %138 = arith.cmpi ne, %137, %c0_i32_46 : i32
    scf.if %138 {
      %c0_47 = arith.constant 0 : index
      %c0_48 = arith.constant 0 : index
      %139 = vector.load %arg10[%c0_47, %c0_48] : memref<8x32xf32, #tpu.memory_space<vmem>>, vector<8x32xf32>
      tpu.vector_store %arg10[%c0_47, %c0_48], %133 {strides = array<i32>} : memref<8x32xf32, #tpu.memory_space<vmem>>, vector<8x32xf32>,
      %c0_49 = arith.constant 0 : index
      %c0_50 = arith.constant 0 : index
      %140 = vector.load %arg11[%c0_49, %c0_50] : memref<8x32xf32, #tpu.memory_space<vmem>>, vector<8x32xf32>
      tpu.vector_store %arg11[%c0_49, %c0_50], %102 {strides = array<i32>} : memref<8x32xf32, #tpu.memory_space<vmem>>, vector<8x32xf32>,
    } else {
    }
    return
  }
  func.func @transform_0(%arg0: i32) -> (i32, i32) {
    %c0_i32 = arith.constant 0 : i32
    %c0_i32_0 = arith.constant 0 : i32
    %c0_i32_1 = arith.constant 0 : i32
    return %c0_i32, %c0_i32_0 : i32, i32
  }
  func.func @transform_1(%arg0: i32) -> (i32, i32) {
    %c0_i32 = arith.constant 0 : i32
    %c0_i32_0 = arith.constant 0 : i32
    %c0_i32_1 = arith.constant 0 : i32
    return %c0_i32, %c0_i32_0 : i32, i32
  }
  func.func @transform_2(%arg0: i32) -> (i32, i32) {
    %c0_i32 = arith.constant 0 : i32
    %c0_i32_0 = arith.constant 0 : i32
    %c0_i32_1 = arith.constant 0 : i32
    return %c0_i32, %c0_i32_0 : i32, i32
  }
  func.func @transform_3(%arg0: i32) -> (i32, i32, i32) {
    %c0_i32 = arith.constant 0 : i32
    %c0_i32_0 = arith.constant 0 : i32
    %c0_i32_1 = arith.constant 0 : i32
    return %arg0, %c0_i32, %c0_i32_0 : i32, i32, i32
  }
  func.func @transform_4(%arg0: i32) -> (i32, i32, i32) {
    %c0_i32 = arith.constant 0 : i32
    %c0_i32_0 = arith.constant 0 : i32
    %c0_i32_1 = arith.constant 0 : i32
    return %arg0, %c0_i32, %c0_i32_0 : i32, i32, i32
  }
  func.func @transform_5(%arg0: i32) -> (i32, i32, i32) {
    %c0_i32 = arith.constant 0 : i32
    %c0_i32_0 = arith.constant 0 : i32
    %c0_i32_1 = arith.constant 0 : i32
    return %arg0, %c0_i32, %c0_i32_0 : i32, i32, i32
  }
  func.func @transform_6(%arg0: i32) -> (i32, i32, i32) {
    %c0_i32 = arith.constant 0 : i32
    %c0_i32_0 = arith.constant 0 : i32
    %c0_i32_1 = arith.constant 0 : i32
    return %arg0, %c0_i32, %c0_i32_0 : i32, i32, i32
  }
  func.func @transform_7(%arg0: i32) -> (i32, i32, i32) {
    %c0_i32 = arith.constant 0 : i32
    %c0_i32_0 = arith.constant 0 : i32
    %c0_i32_1 = arith.constant 0 : i32
    return %arg0, %c0_i32, %c0_i32_0 : i32, i32, i32
  }
  func.func @transform_8(%arg0: i32) -> (i32, i32, i32) {
    %c0_i32 = arith.constant 0 : i32
    %c0_i32_0 = arith.constant 0 : i32
    %c0_i32_1 = arith.constant 0 : i32
    return %arg0, %c0_i32, %c0_i32_0 : i32, i32, i32
  }
  func.func @transform_9(%arg0: i32) -> (i32, i32) {
    %c0_i32 = arith.constant 0 : i32
    %c0_i32_0 = arith.constant 0 : i32
    %c0_i32_1 = arith.constant 0 : i32
    return %c0_i32, %c0_i32_0 : i32, i32
  }
  func.func @transform_10(%arg0: i32) -> (i32, i32) {
    %c0_i32 = arith.constant 0 : i32
    %c0_i32_0 = arith.constant 0 : i32
    %c0_i32_1 = arith.constant 0 : i32
    return %c0_i32, %c0_i32_0 : i32, i32
  }
}

</mosaic_0001>

<bundles_post_ra>
// kernel: tpu_custom_call.1
= control target key start
LH: loop header
LB: loop body
LE: loop exit
PB: predicated region body
PF: predicated region fallthrough
CT: control target
= control target key end

     0   :  { %s2242_s0 = inlined_call_operand.hbm [shape: f32[8,32], index: 0, kind: input, shape index: {}]   ;;  %s2243_s1 = inlined_call_operand.hbm [shape: f32[8,32], index: 1, kind: input, shape index: {}]   ;;  %s2244_s2 = inlined_call_operand.hbm [shape: f32[8,32], index: 2, kind: input, shape index: {}]   ;;  %s2245_s3 = inlined_call_operand.hbm [shape: f32[4,1,32], index: 3, kind: input, shape index: {}]   ;;  %s2246_s4 = inlined_call_operand.vmem [shape: bf16[4,32,160], index: 4, kind: input, shape index: {}]   ;;  %s2247_s5 = inlined_call_operand.vmem [shape: bf16[4,32,32], index: 5, kind: input, shape index: {}]   ;;  %s2248_s6 = inlined_call_operand.vmem [shape: f32[4,1,32], index: 6, kind: input, shape index: {}]   ;;  %s2249_s7 = inlined_call_operand.hbm [shape: bf16[4,32,128], index: 7, kind: input, shape index: {}]   ;;  %s2250_s8 = inlined_call_operand.vmem [shape: bf16[4,64,32], index: 8, kind: input, shape index: {}]   ;;  %s2251_s9 = inlined_call_operand.hbm [shape: f32[8,32], index: 9, kind: output, shape index: {0}]   ;;  %s2252_s10 = inlined_call_operand.hbm [shape: f32[8,32], index: 10, kind: output, shape index: {1}]  }
   0x1   :  { %2256 = sst [smem:[#allocation24_spill]] %s2242_s0 }
   0x2   :  { %2257 = sst [smem:[#allocation25_spill]] %s2243_s1 }
   0x3   :  { %16 = vsyncpa [#allocation5], 0 }
   0x4   :  { %17 = vsyncpa [#allocation8], 0 }
   0x5   :  { %18 = vsyncpa [#allocation11], 0 }
   0x6   :  { %20 = vsyncpa [#allocation11 + $0x1], 0 }
   0x7   :  { %21 = vsyncpa [#allocation6], 0 }
   0x8   :  { %22 = vsyncpa [#allocation15], 0  ;;  %s1918_s13 = smov 0   ;;  %s1920_s14 = smov 0  }
   0x9   :  { %s1922_s15 = smov 0   ;;  %s1924_s16 = smov 0  }
   0xa LB: > { %2258 = sst [smem:[#allocation21_spill]] %s1839_s15  ;;  %s1937_s17 = sadd.s32 4294967295, %s1843_s16   ;;  %s1843_s16 = sphi %s1924_s16, %s2267_s16   ;;  %s1839_s15 = sphi %s1922_s15, %s2269_s15   ;;  %s1835_s14 = sphi %s1920_s14, %s2271_s14   ;;  %s1831_s13 = sphi %s1918_s13, %s2270_s13  }
   0xb   : > { %p111_p0 = scmp.ne.s32.totalorder %s1835_s14, %s1831_s13  ;;  %p112_p1 = scmp.eq.s32.totalorder %s1937_s17, 0 }
   0xc   : > { %p1352_p2 = scmp.ge.s32.totalorder %s1843_s16, 1  ;;  %p294_p3 = scmp.lt.s32.totalorder %s1843_s16, 5 }
   0xd   : > { %p1353_p4 = scmp.ne.s32.totalorder %s1937_s17, 0  ;;  %p1946_p5 = por %p112_p1, %p111_p0 }
   0xe   : > { %s2260_s1 = sld [smem:[#allocation25_spill]]  ;;  %p1953_p6 = pnand %p1352_p2, %p294_p3 }
   0xf   : > { %s1845_s23 = smov [#allocation7]   ;;  %s1966_s26 = sadd.s32 1, %s1843_s16  }
  0x10   : > { %p1481_p7 = pneg %p1953_p6  ;;  %s320_s24 = sshll.u32 %s1845_s23, 4  ;;  %s321_s24 = int_to_ptr.vmem [resolvable:$true] %s320_s24 }
  0x11   : > { %2263 = sst [smem:[#allocation22_spill]] %s1966_s26  ;;  %s98_s27 = sadd.s32 1, %s1839_s15 }
  0x12   : > { %p1961_p8 = pnand %p1481_p7, %p112_p1  ;;  %s95_s28 = ssub.s32 %s1843_s16, %s1966_s26 }
  0x13   : > { %p96_p9 = scmp.eq.s32.totalorder %s95_s28, 0  ;;  %p105_p10 = scmp.ne.s32.totalorder %s1839_s15, %s1835_s14 }
  0x14   : > { %s318_s21 = sshll.u32 %s2260_s1, 4  ;;  %p106_p11 = scmp.eq.s32.totalorder %s1843_s16, 0  ;;  %s319_s21 = int_to_ptr.hbm [resolvable:$true] %s318_s21 }
  0x15   : > { %1487 = dma.hbm_to_vmem [thread:$0]  (!%p1961_p8), %s319_s21, 128, %s321_s24, [#allocation8]  }
  0x16   : > { %p1501_p12 = scmp.lt.s32.totalorder %s1843_s16, 4  ;;  %p107_p13 = por %p106_p11, %p105_p10 }
  0x17   : > { %s1978_s29 = scalar_select %p96_p9, %s1839_s15, %s98_s27  }
  0x18   : > { %s343_s30 = sand.u32 1, %s1843_s16   ;;  %s345_s11 = sand.u32 1, %s1839_s15  }
  0x19   : > { %2264 = sst [smem:[#allocation23_spill]] %s1978_s29  ;;  %s349_s19 = scalar_lea.hbm %s2245_s3, %s1843_s16 }
  0x1a   : > { %s351_s20 = sshll.u32 %s349_s19, 4  ;;  %s346_s23 = scalar_lea.vmem [#allocation10], %s345_s11  ;;  %s352_s20 = int_to_ptr.hbm [resolvable:$true] %s351_s20 }
  0x1b   : > { %s353_s1 = sshll.u32 %s346_s23, 4  ;;  %p1986_p0 = pnand %p1501_p12, %p107_p13  ;;  %s354_s1 = int_to_ptr.vmem [resolvable:$true] %s353_s1 }
  0x1c   : > { %s1357_s24 = sshll.u32 %s345_s11, 4  ;;  %s2266_s0 = sld [smem:[#allocation24_spill]] }
  0x1d   : > { %s386_s15 = scalar_lea.vmem [#allocation12], %s1357_s24  ;;  %s1995_s12 = scalar_lea.sflag [#allocation11], %s343_s30 }
  0x1e   : > { %s1993_s26 = sshll.u32 %s386_s15, 4  ;;  %s1617_s13 = sshra.s32 %s352_s20, 4  ;;  %s1618_s13 = int_to_ptr.hbm [resolvable:$true] %s1617_s13  ;;  %s395_s26 = int_to_ptr.vmem [resolvable:$true] %s1993_s26 }
  0x1f   : > { %s1619_s19 = scalar_lea.hbm %s1618_s13, 1  ;;  %p1621_p3 = pneg %p1986_p0 }
  0x20   : > { %p1620_p2 = scmp.ne.s32.totalorder %s1618_s13, %s1619_s19  ;;  %s1624_s27 = scalar_lea.hbm %s2245_s3, 4 }
  0x21   : > { %p1625_p10 = scmp.lt.s32.totalorder %s1618_s13, %s2245_s3  ;;  %p1626_p11 = scmp.lt.s32.totalorder %s1624_s27, %s1619_s19 }
  0x22   : > { %s306_s29 = sshll.u32 %s2266_s0, 4  ;;  %p1622_p7 = pnand %p1621_p3, %p1620_p2  ;;  %s307_s29 = int_to_ptr.hbm [resolvable:$true] %s306_s29 }
  0x23   : > { %p1627_p12 = por %p1626_p11, %p1625_p10 }
  0x24   : > { %p1623_p9 = pneg %p1622_p7 }
  0x26   : > { %p1628_p13 = pnand %p1627_p12, %p1623_p9 }
  0x28   : > { %1631 = shalt.err (!%p1628_p13)
}
  0x29   : > { %1494 = dma.hbm_to_vmem [thread:$0]  (!%p1986_p0), %s352_s20, 16, %s354_s1, %s1995_s12  }
  0x2a   : > { %s330_s11 = sshll.u32 %s2244_s2, 4  ;;  %s1846_s23 = smov [#allocation4]   ;;  %s331_s11 = int_to_ptr.hbm [resolvable:$true] %s330_s11 }
  0x2b   : > { %s308_s13 = sshll.u32 %s1846_s23, 4  ;;  %s1847_s19 = smov [#allocation9]   ;;  %s309_s13 = int_to_ptr.vmem [resolvable:$true] %s308_s13 }
  0x2c   : > { %1484 = dma.hbm_to_vmem [thread:$0]  (!%p1961_p8), %s307_s29, 128, %s309_s13, [#allocation5]  }
  0x2d   : > { %s332_s27 = sshll.u32 %s1847_s19, 4  ;;  %s1441_s28 = sshll.u32 %s1843_s16, 4  ;;  %s333_s27 = int_to_ptr.vmem [resolvable:$true] %s332_s27 }
  0x2e   : > { %s391_s1 = scalar_lea.hbm %s2249_s7, %s1441_s28  ;;  %s1714_s16 = scalar_lea.hbm %s2249_s7, 64 }
  0x2f   : > { %1490 = dma.hbm_to_vmem [thread:$0]  (!%p1961_p8), %s331_s11, 128, %s333_s27, [#allocation8]  }
  0x30   : > { %s392_s20 = sshll.u32 %s391_s1, 4  ;;  %s393_s20 = int_to_ptr.hbm [resolvable:$true] %s392_s20 }
  0x31   : > { %s1707_s15 = sshra.s32 %s393_s20, 4  ;;  %s1708_s15 = int_to_ptr.hbm [resolvable:$true] %s1707_s15 }
  0x32   : > { %s1709_s30 = scalar_lea.hbm %s1708_s15, 16  ;;  %p1715_p10 = scmp.lt.s32.totalorder %s1708_s15, %s2249_s7 }
  0x33   : > { %p1710_p2 = scmp.ne.s32.totalorder %s1708_s15, %s1709_s30  ;;  %p1716_p11 = scmp.lt.s32.totalorder %s1714_s16, %s1709_s30 }
  0x35   : > { %p1712_p7 = pnand %p1710_p2, %p1621_p3  ;;  %p1717_p8 = por %p1716_p11, %p1715_p10 }
  0x37   : > { %p1713_p9 = pneg %p1712_p7 }
  0x39   : > { %p1718_p12 = pnand %p1717_p8, %p1713_p9 }
  0x3b   : > { %1721 = shalt.err (!%p1718_p12)
}
  0x3c   : > { %s1848_s0 = smov 64   ;;  %s1849_s25 = smov 4  }
  0x3d   : > { %1497 = dma.hbm_to_vmem [thread:$0]  (!%p1986_p0), %s393_s20, 256, %s395_s26, %s1995_s12, %s1848_s0, %s1848_s0, %s1849_s25  }
  0x3e   : > { %414 = sbr.rel (%p1953_p6) target bundleno = 2053 (0x805), region = 56 }
  0x43   : > { %1810 = dma.done.wait (%p112_p1), [#allocation5], 128  }
  0x44   : > { %1812 = vsyncadd (%p112_p1), [#allocation5], 4294967168 }
  0x45   : > { %1814 = dma.done.wait (%p112_p1), [#allocation8], 256  }
  0x46   : > { %1816 = vsyncadd (%p112_p1), [#allocation8], 4294967040  ;;  %s431_s21 = sand.u32 1, %s1937_s17   ;;  %s433_s26 = sand.u32 1, %s1835_s14  }
  0x47   : > { %s432_s12 = scalar_lea.sflag [#allocation11], %s431_s21  ;;  %s2049_s22 = scalar_lea.vmem [#allocation10], %s433_s26 }
  0x48   : > { %1818 = dma.done.wait (%p1946_p5), %s432_s12, 272  }
  0x49   : > { %1820 = vsyncadd (%p1946_p5), %s432_s12, 4294967024  ;;  %s2055_s11 = sshll.u32 %s433_s26, 4  ;;  %p499_p6 = scmp.lt.s32.totalorder %s1937_s17, 3 }
  0x4a   : > { %s444_s21 = scalar_lea.vmem [#allocation12], %s2055_s11 }
  0x4b   : > { %s2059_s27 = scalar_select %p499_p6, %s1937_s17, 3 }
  0x4c   : > { %521 = sbr.rel (%p1353_p4) target bundleno = 84 (0x54), region = 80 }
  0x4d   : > { %s1442_s28 = sshll.u32 %s2059_s27, 5  ;;  %s1443_s24 = sshll.u32 %s2059_s27, 4 }
  0x4e   : > { %s2066_s15 = scalar_lea.vmem %s2246_s4, %s1442_s28  ;;  %s2071_s29 = scalar_lea.vmem %s2247_s5, %s1443_s24 }
  0x4f   : > { %s511_s13 = scalar_lea.vmem %s2248_s6, %s2059_s27  ;;  %s2080_s25 = scalar_lea.vmem %s2250_s8, %s1442_s28 }
  0x51   : > { %v522_v0 = vld [vmem:[#allocation4] sm:$0xff]  ;;  %vm523_vm0 = vcmask 261120   ;;  %v1850_v1 = vmov 0.0  }
  0x52   : > { %524 = vst.msk [vmem:[#allocation2] sm:$0xff] %vm523_vm0, %v522_v0 }
  0x53   : > { %525 = vst.msk [vmem:[#allocation3] sm:$0xff] %vm523_vm0, %v1850_v1 }
  0x54 PF: > { %vm531_vm1 = vcmask 261120   ;;  %v1851_v7 = vmov 32.0   ;;  %v1382_v11 = vld [vmem:[%s2066_s15 + $0x10] sm:$0xf]  ;;  %v1448_v12 = vld [vmem:[%s2066_s15 + $0x14] sm:$0xf0] }
  0x55   : > { %1561 = vrcp.f32 %v1851_v7  ;;  %v1447_v13 = vld [vmem:[%s2066_s15 + $0x14] sm:$0xf]  ;;  %v1383_v14 = vor.u32 %v1448_v12, %v1382_v11  ;;  %v1384_v15 = vld [vmem:[%s2066_s15 + $0x18] sm:$0xf0]  ;;  %v1374_v16 = vld [vmem:[%s2066_s15] sm:$0xf] }
  0x56   : > { %v1446_v17 = vld [vmem:[%s2066_s15 + $0x4] sm:$0xf0]  ;;  %v1387_v18 = vor.u32 %v1447_v13, %v1384_v15  ;;  %v1445_v19 = vld [vmem:[%s2066_s15 + $0x4] sm:$0xf]  ;;  %v1376_v20 = vld [vmem:[%s2066_s15 + $0x8] sm:$0xf0] }
  0x57   : > { %593 = vmatpush.bf16.msra.mxu0 %v1383_v14  ;;  %v1375_v22 = vor.u32 %v1446_v17, %v1374_v16  ;;  %v1379_v23 = vor.u32 %v1445_v19, %v1376_v20  ;;  %v613_v25 = vld [vmem:[#allocation7] sm:$0xff]  ;;  %s1852_s26 = smov 32   ;;  %v1559_v36 = vld [vmem:[%s2049_s22] ss:$0 sm:$0xff]  ;;  %s1853_s12 = smov 96   ;;  %vm684_vm6 = vcmask 64512  }
  0x58   : > { %606 = vmatpush.bf16.msra.mxu1 %v1387_v18  ;;  %v614_v41 = vld [vmem:[#allocation9] sm:$0xff]  ;;  %s1854_s22 = smov 112   ;;  %s1855_s28 = smov 120   ;;  %vm899_vm12 = vcmask 1043456  }
  0x59   : > { %v526_v2 = vld [vmem:[#allocation2] sm:$0xff]  ;;  %s1856_s24 = smov 104   ;;  %s1857_s1 = smov 64  }
  0x5a   : > { %v527_v3 = vld [vmem:[#allocation3] sm:$0xff]  ;;  %s1858_s20 = smov 8   ;;  %s1859_s15 = smov 16  }
  0x5b   : > { %v2085_v4 = vadd.f32 %v527_v3, %v526_v2  ;;  %v1562_v8 = vpop.eup %1561  ;;  %594 = vmatpush.bf16.msra.mxu0 %v1375_v22  ;;  %s1860_s18 = smov 24   ;;  %p1434_p1 = scmp.ne.s32.totalorder %s1937_s17, 3 }
  0x5c   : > { %v536_v9 = vmul.f32 32.0, %v1562_v8  ;;  %vm540_vm2 = vweird.f32 %v1562_v8  ;;  %607 = vmatpush.bf16.msra.mxu1 %v1379_v23  ;;  %v780_v23 = vlaneseq }
  0x5d   : > { %v530_v5 = vmul.f32 %v2085_v4, %v2085_v4 }
  0x5e   : > { %v537_v10 = vsub.f32 1.0, %v536_v9 }
  0x5f   : > { %v532_v6 = vsel %vm531_vm1, %v530_v5, 0.0 }
  0x60   : > { %533 = vadd.xlane.f32.xlu0 %v532_v6  ;;  %v538_v21 = vmul.f32 %v1562_v8, %v537_v10 }
  0x62   : > { %v539_v24 = vadd.f32 %v1562_v8, %v538_v21 }
  0x64   : > { %v2098_v26 = vsel %vm540_vm2, %v1562_v8, %v539_v24  ;;  %v781_v24 = vshrl.u32 %v780_v23, 7 }
  0x74   : > { %627 = vrot.lane.b32.xlu0 %v613_v25, %s1852_s26 }
  0xd3   : > { %v534_v27 = vpop.xlane.xlu0 %533 }
  0xd4   : > { %v542_v28 = vmul.f32 %v2098_v26, %v534_v27 }
  0xd6   : > { %v543_v29 = vadd.f32 1e-06, %v542_v28 }
  0xd8   : > { %1563 = vrsqrt.f32 %v543_v29  ;;  %vm550_vm4 = vweird.f32 %v543_v29 }
  0xde   : > { %v1564_v30 = vpop.eup %1563 }
  0xdf   : > { %v545_v31 = vmul.f32 %v1564_v30, %v543_v29  ;;  %vm551_vm3 = vweird.f32 %v1564_v30 }
  0xe0   : > { %vm552_vm5 = vmor %vm550_vm4, %vm551_vm3 }
  0xe1   : > { %v546_v32 = vmul.f32 %v1564_v30, %v545_v31 }
  0xe3   : > { %v547_v33 = vmul.f32 0.5, %v546_v32 }
  0xe5   : > { %v548_v34 = vsub.f32 1.5, %v547_v33 }
  0xe6   : > { %v628_v47 = vpop.permute.xlu0 %627 }
  0xe7   : > { %v549_v35 = vmul.f32 %v1564_v30, %v548_v34 }
  0xe9   : > { %v553_v37 = vsel %vm552_vm5, %v1564_v30, %v549_v35 }
  0xea   : > { %v554_v38 = vmul.f32 %v553_v37, %v2085_v4 }
  0xec   : > { %v558_v39 = vmul.f32 %v1559_v36, %v554_v38 }
  0xee   : > { %v559_v40 = vpack.c.bf16 %v558_v39, %v558_v39 }
  0xf0   : > { %1388 = vmatmul.msk.bf16.vlgmr.msra.gmra.mxu0 %vm531_vm1, %v559_v40  ;;  %1389 = vmatmul.msk.bf16.vlgmr.msra.gmra.mxu1 %vm531_vm1, %v559_v40 }
 0x16d   : > { %v2106_v42 = vpop.f32.mrf.mxu0  ;;  %v609_v43 = vpop.f32.mrf.mxu1 }
 0x16e   : > { %v631_v44 = vmul.f32 %v614_v41, %v609_v43  ;;  %v630_v48 = vmul.f32 %v628_v47, %v2106_v42  ;;  %v615_v57 = vmul.f32 %v613_v25, %v2106_v42  ;;  %v783_v25 = vand.u32 127, %v780_v23 }
 0x170   : > { %633 = vrot.lane.b32.xlu1 %v631_v44, %s1852_s26  ;;  %vm784_vm7 = vcmp.le.s32.totalorder %v783_v25, %v781_v24 }
 0x175   : > { %v598_v45 = vpop.f32.mrf.mxu0  ;;  %v611_v46 = vpop.f32.mrf.mxu1 }
 0x178   : > { %617 = vrot.lane.b32.xlu1 %v614_v41, %s1853_s12 }
 0x1e2   : > { %v634_v49 = vpop.permute.xlu1 %633 }
 0x1e3   : > { %v636_v50 = vadd.f32 %v634_v49, %v630_v48 }
 0x1e5   : > { %655 = vrot.lane.b32.xlu1 %v636_v50, %s1854_s22  ;;  %652 = vrot.lane.b32.xlu2 %v636_v50, %s1855_s28  ;;  %v661_v0 = vpack.c.bf16 %v636_v50, %v636_v50 }
 0x1e7   : > { %v680_v3 = vunpack.c.l.b16 %v661_v0 }
 0x1e9   : > { %v681_v7 = vpack.c.b16 %v680_v3, %v680_v3 }
 0x1ea   : > { %v618_v51 = vpop.permute.xlu1 %617 }
 0x1eb   : > { %v620_v52 = vmul.f32 %v618_v51, %v2106_v42 }
 0x1ed   : > { %622 = vrot.lane.b32.xlu2 %v620_v52, %s1852_s26 }
 0x1f5   : > { %658 = vrot.lane.b32.xlu2 %v636_v50, %s1856_s24 }
 0x23f   : > { %v653_v53 = vpop.permute.xlu2 %652 }
 0x240   : > { %v662_v54 = vpack.c.bf16 %v653_v53, %v653_v53 }
 0x242   : > { %v705_v55 = vunpack.c.l.b16 %v662_v54 }
 0x244   : > { %v706_v56 = vpack.c.b16 %v705_v55, %v705_v55 }
 0x246   : > { %707 = vrot.lane.b32.xlu1 %v706_v56, %s1853_s12 }
 0x247   : > { %v623_v58 = vpop.permute.xlu2 %622 }
 0x248   : > { %v625_v59 = vadd.f32 %v623_v58, %v615_v57 }
 0x24a   : > { %638 = vrot.lane.b32.xlu2 %v625_v59, %s1855_s28  ;;  %v647_v20 = vpack.c.bf16 %v625_v59, %v625_v59 }
 0x24f   : > { %v659_v60 = vpop.permute.xlu2 %658 }
 0x250   : > { %v664_v61 = vpack.c.bf16 %v659_v60, %v659_v60 }
 0x252   : > { %v753_v62 = vunpack.c.l.b16 %v664_v61  ;;  %641 = vrot.lane.b32.xlu2 %v625_v59, %s1854_s22 }
 0x254   : > { %v754_v63 = vpack.c.b16 %v753_v62, %v753_v62 }
 0x256   : > { %755 = vrot.lane.b32.xlu1 %v754_v63, %s1853_s12 }
 0x257   : > { %v656_v1 = vpop.permute.xlu1 %655 }
 0x258   : > { %v663_v2 = vpack.c.bf16 %v656_v1, %v656_v1 }
 0x25a   : > { %v729_v5 = vunpack.c.l.b16 %v663_v2 }
 0x25c   : > { %v730_v6 = vpack.c.b16 %v729_v5, %v729_v5 }
 0x25e   : > { %731 = vrot.lane.b32.xlu0 %v730_v6, %s1853_s12  ;;  %682 = vrot.lane.b32.xlu1 %v681_v7, %s1853_s12 }
 0x266   : > { %644 = vrot.lane.b32.xlu0 %v625_v59, %s1856_s24 }
 0x2a4   : > { %v639_v10 = vpop.permute.xlu2 %638 }
 0x2a5   : > { %v648_v11 = vpack.c.bf16 %v639_v10, %v639_v10 }
 0x2ac   : > { %v642_v18 = vpop.permute.xlu2 %641 }
 0x2ad   : > { %v649_v19 = vpack.c.bf16 %v642_v18, %v642_v18 }
 0x2b8   : > { %v708_v8 = vpop.permute.xlu1 %707 }
 0x2b9   : > { %v713_v9 = vsel %vm684_vm6, %v708_v8, 0 }
 0x2ba   : > { %722 = vmatpush.bf16.xpose.msra.mxu3 %v713_v9 }
 0x2c1   : > { %1391 = vmatmul.msk.bf16.vlgmr.msra.gmra.mxu3 %vm684_vm6, %v648_v11 }
 0x2c8   : > { %v756_v12 = vpop.permute.xlu1 %755 }
 0x2c9   : > { %v761_v13 = vsel %vm684_vm6, %v756_v12, 0  ;;  %v675_v12 = vpack.c.bf16 %v2106_v42, %v2106_v42 }
 0x2ca   : > { %770 = vmatpush.bf16.xpose.msrb.mxu1 %v761_v13 }
 0x2cb   : > { %v892_v13 = vunpack.c.l.b16 %v675_v12 }
 0x2d0   : > { %v732_v14 = vpop.permute.xlu0 %731  ;;  %v683_v15 = vpop.permute.xlu1 %682 }
 0x2d1   : > { %v689_v16 = vsel %vm684_vm6, %v683_v15, 0  ;;  %v737_v17 = vsel %vm684_vm6, %v732_v14, 0  ;;  %v893_v14 = vpack.c.b16 %v892_v13, %v892_v13 }
 0x2d2   : > { %698 = vmatpush.bf16.xpose.msra.mxu2 %v689_v16  ;;  %746 = vmatpush.bf16.xpose.msrb.mxu0 %v737_v17 }
 0x2d8   : > { %v645_v21 = vpop.permute.xlu0 %644 }
 0x2d9   : > { %v650_v22 = vpack.c.bf16 %v645_v21, %v645_v21  ;;  %1390 = vmatmul.msk.bf16.vlgmr.msra.gmra.mxu2 %vm684_vm6, %v647_v20  ;;  %1392 = vmatmul.msk.bf16.vlgmr.msrb.gmra.mxu0 %vm684_vm6, %v649_v19 }
 0x2db   : > { %1393 = vmatmul.msk.bf16.vlgmr.msrb.gmra.mxu1 %vm684_vm6, %v650_v22 }
 0x344   : > { %v724_v27 = vpop.f32.mrf.mxu3 }
 0x345   : > { %v777_v28 = vmul.f32 0.35355338, %v724_v27 }
 0x347   : > { %v788_v29 = vsel %vm784_vm7, %v777_v28, -1e+30 }
 0x348   : > { %v794_v30 = vsel %vm684_vm6, %v788_v29, -inf }
 0x349   : > { %795 = vmax.xlane.f32.xlu2 %v794_v30 }
 0x34c   : > { %v726_v31 = vpop.f32.mrf.mxu3 }
 0x356   : > { %v748_v32 = vpop.f32.mrf.mxu0 }
 0x357   : > { %v778_v33 = vmul.f32 0.35355338, %v748_v32 }
 0x358   : > { %v772_v34 = vpop.f32.mrf.mxu1 }
 0x359   : > { %v779_v35 = vmul.f32 0.35355338, %v772_v34  ;;  %v789_v36 = vsel %vm784_vm7, %v778_v33, -1e+30 }
 0x35a   : > { %v797_v37 = vsel %vm684_vm6, %v789_v36, -inf }
 0x35b   : > { %798 = vmax.xlane.f32.xlu0 %v797_v37  ;;  %v790_v38 = vsel %vm784_vm7, %v779_v35, -1e+30 }
 0x35c   : > { %v700_v39 = vpop.f32.mrf.mxu2  ;;  %v800_v40 = vsel %vm684_vm6, %v790_v38, -inf }
 0x35d   : > { %801 = vmax.xlane.f32.xlu1 %v800_v40  ;;  %v776_v45 = vmul.f32 0.35355338, %v700_v39 }
 0x35e   : > { %v750_v41 = vpop.f32.mrf.mxu0 }
 0x35f   : > { %v787_v46 = vsel %vm784_vm7, %v776_v45, -1e+30 }
 0x360   : > { %v774_v43 = vpop.f32.mrf.mxu1  ;;  %v791_v47 = vsel %vm684_vm6, %v787_v46, -inf }
 0x361   : > { %666 = vrot.lane.b32.xlu2 %v2106_v42, %s1855_s28 }
 0x364   : > { %v702_v44 = vpop.f32.mrf.mxu2 }
 0x36f   : > { %669 = vrot.lane.b32.xlu0 %v2106_v42, %s1854_s22 }
 0x376   : > { %672 = vrot.lane.b32.xlu1 %v2106_v42, %s1856_s24 }
 0x38a   : > { %792 = vmax.xlane.f32.xlu2 %v791_v47 }
 0x3bc   : > { %v796_v48 = vpop.xlane.xlu2 %795 }
 0x3bd   : > { %v804_v49 = vsub.f32 %v788_v29, %v796_v48 }
 0x3bf   : > { %v809_v50 = vmul.f32 1.442695, %v804_v49 }
 0x3c1   : > { %1565 = vpow2.f32 %v809_v50 }
 0x3c4   : > { %v667_v55 = vpop.permute.xlu2 %666 }
 0x3c5   : > { %v676_v59 = vpack.c.bf16 %v667_v55, %v667_v55 }
 0x3c7   : > { %v1566_v51 = vpop.eup %1565  ;;  %v917_v61 = vunpack.c.l.b16 %v676_v59 }
 0x3c8   : > { %v818_v52 = vsel %vm684_vm6, %v1566_v51, 0.0 }
 0x3c9   : > { %819 = vadd.xlane.f32.xlu0 %v818_v52  ;;  %v918_v1 = vpack.c.b16 %v917_v61, %v917_v61 }
 0x3ce   : > { %v799_v53 = vpop.xlane.xlu0 %798 }
 0x3cf   : > { %v805_v54 = vsub.f32 %v789_v36, %v799_v53 }
 0x3d0   : > { %v802_v56 = vpop.xlane.xlu1 %801 }
 0x3d1   : > { %v811_v57 = vmul.f32 1.442695, %v805_v54  ;;  %v806_v58 = vsub.f32 %v790_v38, %v802_v56 }
 0x3d3   : > { %1567 = vpow2.f32 %v811_v57  ;;  %v813_v60 = vmul.f32 1.442695, %v806_v58 }
 0x3d5   : > { %1569 = vpow2.f32 %v813_v60 }
 0x3d9   : > { %v2147_v62 = vpop.eup %1567 }
 0x3da   : > { %v821_v63 = vsel %vm684_vm6, %v2147_v62, 0.0 }
 0x3db   : > { %v2151_v0 = vpop.eup %1569  ;;  %822 = vadd.xlane.f32.xlu1 %v821_v63 }
 0x3dc   : > { %v824_v2 = vsel %vm684_vm6, %v2151_v0, 0.0 }
 0x3dd   : > { %919 = vrot.lane.b32.xlu0 %v918_v1, %s1857_s1  ;;  %825 = vadd.xlane.f32.xlu2 %v824_v2 }
 0x3e1   : > { %v670_v3 = vpop.permute.xlu0 %669 }
 0x3e2   : > { %v677_v7 = vpack.c.bf16 %v670_v3, %v670_v3 }
 0x3e4   : > { %v941_v9 = vunpack.c.l.b16 %v677_v7 }
 0x3e6   : > { %v942_v11 = vpack.c.b16 %v941_v9, %v941_v9 }
 0x3e8   : > { %v673_v5 = vpop.permute.xlu1 %672 }
 0x3e9   : > { %v678_v6 = vpack.c.bf16 %v673_v5, %v673_v5 }
 0x3eb   : > { %v965_v8 = vunpack.c.l.b16 %v678_v6 }
 0x3ed   : > { %v966_v10 = vpack.c.b16 %v965_v8, %v965_v8 }
 0x3f4   : > { %967 = vrot.lane.b32.xlu1 %v966_v10, %s1857_s1 }
 0x3f5   : > { %943 = vrot.lane.b32.xlu2 %v942_v11, %s1857_s1 }
 0x3fd   : > { %v793_v15 = vpop.xlane.xlu2 %792  ;;  %894 = vrot.lane.b32.xlu2 %v893_v14, %s1857_s1 }
 0x3fe   : > { %v803_v16 = vsub.f32 %v787_v46, %v793_v15 }
 0x400   : > { %v807_v17 = vmul.f32 1.442695, %v803_v16 }
 0x402   : > { %1571 = vpow2.f32 %v807_v17 }
 0x408   : > { %v2161_v18 = vpop.eup %1571 }
 0x409   : > { %v815_v19 = vsel %vm684_vm6, %v2161_v18, 0.0 }
 0x40a   : > { %816 = vadd.xlane.f32.xlu0 %v815_v19 }
 0x43c   : > { %v820_v20 = vpop.xlane.xlu0 %819 }
 0x43d   : > { %1573 = vrcp.f32 %v820_v20  ;;  %v853_v23 = vand.u32 2147483648, %v820_v20  ;;  %v851_v25 = vand.u32 2147483647, %v820_v20  ;;  %vm847_vm9 = vweird.f32 %v820_v20 }
 0x43f   : > { %v854_v28 = vor.u32 1.1754944e-38, %v853_v23  ;;  %vm852_vm11 = vcmp.eq.f32.partialorder %v851_v25, 8.507059e+37 }
 0x443   : > { %v1574_v42 = vpop.eup %1573 }
 0x444   : > { %v843_v21 = vmul.f32 %v1574_v42, %v820_v20  ;;  %vm848_vm8 = vweird.f32 %v1574_v42 }
 0x445   : > { %vm849_vm10 = vmor %vm847_vm9, %vm848_vm8 }
 0x446   : > { %v844_v22 = vsub.f32 1.0, %v843_v21 }
 0x448   : > { %v845_v24 = vmul.f32 %v1574_v42, %v844_v22 }
 0x44a   : > { %v846_v27 = vadd.f32 %v1574_v42, %v845_v24 }
 0x44c   : > { %v850_v29 = vsel %vm849_vm10, %v1574_v42, %v846_v27  ;;  %v1449_v27 = vld [vmem:[%s2071_s29] sm:$0xff] }
 0x44d   : > { %v855_v30 = vsel %vm852_vm11, %v854_v28, %v850_v29  ;;  %vm1001_vm11 = vcmask 130048  }
 0x44e   : > { %v823_v31 = vpop.xlane.xlu1 %822  ;;  %v856_v32 = vmul.f32 %v1566_v51, %v855_v30 }
 0x44f   : > { %1575 = vrcp.f32 %v823_v31  ;;  %v920_v33 = vpop.permute.xlu0 %919  ;;  %v868_v44 = vand.u32 2147483648, %v823_v31  ;;  %v866_v47 = vand.u32 2147483647, %v823_v31  ;;  %vm862_vm14 = vweird.f32 %v823_v31 }
 0x450   : > { %v826_v34 = vpop.xlane.xlu2 %825  ;;  %v925_v35 = vsel %vm899_vm12, %v920_v33, 0  ;;  %v888_v36 = vpack.c.bf16 %v856_v32, %v856_v32 }
 0x451   : > { %1577 = vrcp.f32 %v826_v34  ;;  %934 = vmatpush.bf16.msrb.mxu3 %v925_v35  ;;  %v883_v51 = vand.u32 2147483648, %v826_v34  ;;  %v869_v52 = vor.u32 1.1754944e-38, %v868_v44  ;;  %v881_v53 = vand.u32 2147483647, %v826_v34 }
 0x452   : > { %vm867_vm2 = vcmp.eq.f32.partialorder %v866_v47, 8.507059e+37  ;;  %vm877_vm3 = vweird.f32 %v826_v34 }
 0x453   : > { %v884_v59 = vor.u32 1.1754944e-38, %v883_v51  ;;  %vm882_vm5 = vcmp.eq.f32.partialorder %v881_v53, 8.507059e+37  ;;  %v1560_v51 = vld [vmem:[%s511_s13] ss:$0 sm:$0xff] }
 0x454   : > { %1395 = vmatmul.msk.bf16.vlgmr.msrb.gmra.mxu3 %vm684_vm6, %v888_v36 }
 0x455   : > { %v1576_v37 = vpop.eup %1575 }
 0x456   : > { %v858_v38 = vmul.f32 %v1576_v37, %v823_v31  ;;  %vm863_vm13 = vweird.f32 %v1576_v37 }
 0x457   : > { %v1578_v39 = vpop.eup %1577  ;;  %vm864_vm0 = vmor %vm862_vm14, %vm863_vm13 }
 0x458   : > { %v859_v40 = vsub.f32 1.0, %v858_v38  ;;  %v873_v41 = vmul.f32 %v1578_v39, %v826_v34  ;;  %v944_v43 = vpop.permute.xlu2 %943  ;;  %vm878_vm15 = vweird.f32 %v1578_v39 }
 0x459   : > { %v949_v45 = vsel %vm899_vm12, %v944_v43, 0  ;;  %vm879_vm4 = vmor %vm877_vm3, %vm878_vm15 }
 0x45a   : > { %v860_v46 = vmul.f32 %v1576_v37, %v859_v40  ;;  %v874_v48 = vsub.f32 1.0, %v873_v41  ;;  %958 = vmatpush.bf16.msra.mxu0 %v949_v45  ;;  %v1452_v40 = vld [vmem:[%s444_s21 + $0x8] sm:$0xff]  ;;  %v1451_v41 = vld [vmem:[%s444_s21] sm:$0xff] }
 0x45b   : > { %1086 = vmatpush.bf16.msra.mxu3 %v1452_v40 }
 0x45c   : > { %v861_v49 = vadd.f32 %v1576_v37, %v860_v46  ;;  %v875_v50 = vmul.f32 %v1578_v39, %v874_v48 }
 0x45e   : > { %v865_v54 = vsel %vm864_vm0, %v1576_v37, %v861_v49  ;;  %v876_v55 = vadd.f32 %v1578_v39, %v875_v50 }
 0x45f   : > { %v870_v56 = vsel %vm867_vm2, %v869_v52, %v865_v54  ;;  %1087 = vmatpush.bf16.msra.mxu3 %v1451_v41 }
 0x460   : > { %v871_v57 = vmul.f32 %v2147_v62, %v870_v56  ;;  %v880_v58 = vsel %vm879_vm4, %v1578_v39, %v876_v55  ;;  %v895_v60 = vpop.permute.xlu2 %894  ;;  %v1456_v55 = vld [vmem:[%s2080_s25 + $0x18] sm:$0xff]  ;;  %v1455_v56 = vld [vmem:[%s2080_s25 + $0x10] sm:$0xff]  ;;  %vm1151_vm4 = vcmask 523264  }
 0x461   : > { %v901_v61 = vsel %vm899_vm12, %v895_v60, 0  ;;  %v885_v63 = vsel %vm882_vm5, %v884_v59, %v880_v58  ;;  %1159 = vmatpush.bf16.msrb.mxu0 %v1456_v55 }
 0x462   : > { %910 = vmatpush.bf16.msrb.mxu2 %v901_v61  ;;  %v889_v1 = vpack.c.bf16 %v871_v57, %v871_v57  ;;  %v886_v2 = vmul.f32 %v2151_v0, %v885_v63  ;;  %v1454_v57 = vld [vmem:[%s2080_s25 + $0x8] sm:$0xff] }
 0x464   : > { %1396 = vmatmul.msk.bf16.vlgmr.msra.gmra.mxu0 %vm684_vm6, %v889_v1  ;;  %v890_v6 = vpack.c.bf16 %v886_v2, %v886_v2  ;;  %v1453_v1 = vld [vmem:[%s2080_s25] sm:$0xff] }
 0x465   : > { %1160 = vmatpush.bf16.msrb.mxu0 %v1455_v56 }
 0x466   : > { %v968_v3 = vpop.permute.xlu1 %967 }
 0x467   : > { %v973_v5 = vsel %vm899_vm12, %v968_v3, 0  ;;  %vm1003_vm12 = vcmask 195584  }
 0x468   : > { %982 = vmatpush.bf16.msra.mxu1 %v973_v5 }
 0x469   : > { %1161 = vmatpush.bf16.msrb.mxu0 %v1454_v57 }
 0x46b   : > { %1397 = vmatmul.msk.bf16.vlgmr.msra.gmra.mxu1 %vm684_vm6, %v890_v6 }
 0x46d   : > { %1162 = vmatpush.bf16.msrb.mxu0 %v1453_v1 }
 0x47d   : > { %v817_v62 = vpop.xlane.xlu0 %816 }
 0x47e   : > { %1579 = vrcp.f32 %v817_v62  ;;  %v838_v10 = vand.u32 2147483648, %v817_v62  ;;  %v836_v12 = vand.u32 2147483647, %v817_v62  ;;  %vm832_vm8 = vweird.f32 %v817_v62 }
 0x480   : > { %v839_v0 = vor.u32 1.1754944e-38, %v838_v10  ;;  %vm837_vm10 = vcmp.eq.f32.partialorder %v836_v12, 8.507059e+37 }
 0x484   : > { %v1580_v7 = vpop.eup %1579 }
 0x485   : > { %v828_v8 = vmul.f32 %v1580_v7, %v817_v62  ;;  %vm833_vm7 = vweird.f32 %v1580_v7 }
 0x486   : > { %vm834_vm9 = vmor %vm832_vm8, %vm833_vm7 }
 0x487   : > { %v829_v9 = vsub.f32 1.0, %v828_v8 }
 0x489   : > { %v830_v11 = vmul.f32 %v1580_v7, %v829_v9 }
 0x48b   : > { %v831_v13 = vadd.f32 %v1580_v7, %v830_v11 }
 0x48d   : > { %v835_v14 = vsel %vm834_vm9, %v1580_v7, %v831_v13 }
 0x48e   : > { %v840_v15 = vsel %vm837_vm10, %v839_v0, %v835_v14 }
 0x48f   : > { %v841_v16 = vmul.f32 %v2161_v18, %v840_v15  ;;  %v1450_v18 = vld [vmem:[%s2071_s29 + $0x8] sm:$0xff] }
 0x490   : > { %1031 = vmatpush.bf16.msra.mxu2 %v1450_v18 }
 0x491   : > { %v887_v17 = vpack.c.bf16 %v841_v16, %v841_v16 }
 0x493   : > { %1394 = vmatmul.msk.bf16.vlgmr.msrb.gmra.mxu2 %vm684_vm6, %v887_v17 }
 0x494   : > { %1032 = vmatpush.bf16.msra.mxu2 %v1449_v27 }
 0x4d7   : > { %v936_v19 = vpop.f32.mrf.mxu3 }
 0x4d8   : > { %989 = vrot.lane.b32.xlu1 %v936_v19, %s1858_s20 }
 0x4df   : > { %v938_v20 = vpop.f32.mrf.mxu3 }
 0x4e1   : > { %v960_v42 = vpop.f32.mrf.mxu0 }
 0x4e2   : > { %993 = vrot.lane.b32.xlu2 %v960_v42, %s1859_s15 }
 0x4e8   : > { %v984_v21 = vpop.f32.mrf.mxu1 }
 0x4e9   : > { %v962_v22 = vpop.f32.mrf.mxu0  ;;  %997 = vrot.lane.b32.xlu1 %v984_v21, %s1860_s18 }
 0x4f0   : > { %v986_v23 = vpop.f32.mrf.mxu1 }
 0x516   : > { %v912_v24 = vpop.f32.mrf.mxu2 }
 0x51e   : > { %v914_v25 = vpop.f32.mrf.mxu2 }
 0x53c   : > { %v994_v30 = vpop.permute.xlu2 %993 }
 0x54a   : > { %v990_v28 = vpop.permute.xlu1 %989 }
 0x54b   : > { %v1000_v29 = vsel %vm684_vm6, %v912_v24, %v990_v28 }
 0x54c   : > { %v1002_v31 = vsel %vm1001_vm11, %v1000_v29, %v994_v30 }
 0x55b   : > { %v998_v32 = vpop.permute.xlu1 %997 }
 0x55c   : > { %v1004_v33 = vsel %vm1003_vm12, %v1002_v31, %v998_v32 }
 0x55d   : > { %v1005_v34 = vpack.c.bf16 %v1004_v33, %v1004_v33 }
 0x55f   : > { %1406 = vmatmul.msk.bf16.vlgmr.msra.gmra.mxu2 %vm531_vm1, %v1005_v34 }
 0x5e2   : > { %v1034_v35 = vpop.f32.mrf.mxu2 }
 0x5e3   : > { %v2181_v36 = vadd.f32 %v1034_v35, %v2085_v4 }
 0x5e5   : > { %1169 = vst.msk [vmem:[#allocation3] sm:$0xff] %vm531_vm1, %v2181_v36  ;;  %v1039_v37 = vmul.f32 %v2181_v36, %v2181_v36 }
 0x5e7   : > { %v1040_v38 = vsel %vm531_vm1, %v1039_v37, 0.0 }
 0x5e8   : > { %1041 = vadd.xlane.f32.xlu2 %v1040_v38 }
 0x5ea   : > { %v1036_v39 = vpop.f32.mrf.mxu2 }
 0x65b   : > { %v1042_v43 = vpop.xlane.xlu2 %1041 }
 0x65c   : > { %v1043_v4 = vmul.f32 %v1042_v43, %v2098_v26 }
 0x65e   : > { %v1044_v44 = vadd.f32 1e-06, %v1043_v4 }
 0x660   : > { %1581 = vrsqrt.f32 %v1044_v44  ;;  %vm1051_vm13 = vweird.f32 %v1044_v44 }
 0x666   : > { %v1582_v45 = vpop.eup %1581 }
 0x667   : > { %v1046_v46 = vmul.f32 %v1582_v45, %v1044_v44  ;;  %vm1052_vm6 = vweird.f32 %v1582_v45 }
 0x668   : > { %vm1053_vm14 = vmor %vm1051_vm13, %vm1052_vm6 }
 0x669   : > { %v1047_v47 = vmul.f32 %v1582_v45, %v1046_v46 }
 0x66b   : > { %v1048_v48 = vmul.f32 0.5, %v1047_v47 }
 0x66d   : > { %v1049_v49 = vsub.f32 1.5, %v1048_v48 }
 0x66f   : > { %v1050_v50 = vmul.f32 %v1582_v45, %v1049_v49 }
 0x671   : > { %v1054_v26 = vsel %vm1053_vm14, %v1582_v45, %v1050_v50 }
 0x672   : > { %v1055_v52 = vmul.f32 %v1054_v26, %v2181_v36 }
 0x674   : > { %v1059_v53 = vmul.f32 %v1560_v51, %v1055_v52 }
 0x676   : > { %v1060_v54 = vpack.c.bf16 %v1059_v53, %v1059_v53 }
 0x678   : > { %1415 = vmatmul.msk.bf16.vlgmr.msra.gmra.mxu3 %vm531_vm1, %v1060_v54 }
 0x6fb   : > { %v1089_v58 = vpop.f32.mrf.mxu3 }
 0x6fc   : > { %1114 = vrot.lane.b32.xlu1 %v1089_v58, %s1857_s1  ;;  %v1416_v60 = vmul.f32 -1.442695, %v1089_v58 }
 0x6fe   : > { %1583 = vpow2.f32 %v1416_v60 }
 0x703   : > { %v1091_v59 = vpop.f32.mrf.mxu3 }
 0x704   : > { %v1584_v61 = vpop.eup %1583 }
 0x705   : > { %v1096_v63 = vadd.f32 1.0, %v1584_v61 }
 0x707   : > { %1585 = vrcp.f32 %v1096_v63  ;;  %v1108_v7 = vand.u32 2147483648, %v1096_v63  ;;  %vm1102_vm0 = vweird.f32 %v1096_v63  ;;  %v1106_v8 = vand.u32 2147483647, %v1096_v63 }
 0x709   : > { %v1109_v10 = vor.u32 1.1754944e-38, %v1108_v7  ;;  %vm1107_vm3 = vcmp.eq.f32.partialorder %v1106_v8, 8.507059e+37 }
 0x70d   : > { %v1586_v2 = vpop.eup %1585 }
 0x70e   : > { %v1098_v3 = vmul.f32 %v1586_v2, %v1096_v63  ;;  %vm1103_vm15 = vweird.f32 %v1586_v2 }
 0x70f   : > { %vm1104_vm2 = vmor %vm1102_vm0, %vm1103_vm15 }
 0x710   : > { %v1099_v5 = vsub.f32 1.0, %v1098_v3 }
 0x712   : > { %v1100_v6 = vmul.f32 %v1586_v2, %v1099_v5 }
 0x714   : > { %v1101_v62 = vadd.f32 %v1586_v2, %v1100_v6 }
 0x716   : > { %v1105_v9 = vsel %vm1104_vm2, %v1586_v2, %v1101_v62 }
 0x717   : > { %v1110_v11 = vsel %vm1107_vm3, %v1109_v10, %v1105_v9 }
 0x718   : > { %v1112_v12 = vmul.f32 %v1110_v11, %v1089_v58 }
 0x76e   : > { %v1115_v13 = vpop.permute.xlu1 %1114 }
 0x76f   : > { %v1117_v0 = vmul.f32 %v1115_v13, %v1112_v12 }
 0x771   : > { %v1118_v14 = vpack.c.bf16 %v1117_v0, %v1117_v0 }
 0x773   : > { %1433 = vmatmul.msk.bf16.vlgmr.msrb.gmra.mxu0 %vm1151_vm4, %v1118_v14 }
 0x7f0   : > { %v1164_v15 = vpop.f32.mrf.mxu0 }
 0x7f1   : > { %1168 = vst.msk [vmem:[#allocation2] sm:$0xff] %vm531_vm1, %v1164_v15 }
 0x7f4   : > { %1173 = sbr.rel (%p1434_p1) target bundleno = 2043 (0x7fb), region = 84 }
 0x7f8   : > { %v1166_v16 = vpop.f32.mrf.mxu0 }
 0x7f9   : > { %1174 = vst.msk [vmem:[#allocation13] sm:$0xff] %vm531_vm1, %v1164_v15 }
 0x7fa   : > { %1175 = vst.msk [vmem:[#allocation14] sm:$0xff] %vm531_vm1, %v2181_v36 }
 0x7fb PF: > { %p1505_p4 = scmp.eq.s32.totalorder %s1937_s17, 3  ;;  %s1861_s27 = smov [#allocation13]  }
 0x7fc   : > { %s1182_s29 = sshll.u32 %s1861_s27, 4  ;;  %s1184_s13 = sshll.u32 %s2251_s9, 4  ;;  %s1183_s29 = int_to_ptr.vmem [resolvable:$true] %s1182_s29  ;;  %s1185_s13 = int_to_ptr.hbm [resolvable:$true] %s1184_s13 }
 0x7fd   : > { %1474 = dma.vmem_to_hbm [thread:$0]  (%p1505_p4), %s1183_s29, 128, %s1185_s13, [#allocation6]  }
 0x7fe   : > { %s1196_s25 = sshll.u32 %s2252_s10, 4  ;;  %s1862_s21 = smov [#allocation14]   ;;  %s1197_s25 = int_to_ptr.hbm [resolvable:$true] %s1196_s25 }
 0x7ff   : > { %s1194_s26 = sshll.u32 %s1862_s21, 4  ;;  %s1195_s26 = int_to_ptr.vmem [resolvable:$true] %s1194_s26 }
 0x800   : > { %1476 = dma.vmem_to_hbm [thread:$0]  (%p1505_p4), %s1195_s26, 128, %s1197_s25, [#allocation15]  }
 0x801   : > { %1822 = dma.done.wait (%p1505_p4), [#allocation6], 128  }
 0x802   : > { %1824 = vsyncadd (%p1505_p4), [#allocation6], 4294967168 }
 0x803   : > { %1826 = dma.done.wait (%p1505_p4), [#allocation15], 128  }
 0x804   : > { %1828 = vsyncadd (%p1505_p4), [#allocation15], 4294967168 }
 0x805 PF: > { %s2267_s16 = sld [smem:[#allocation22_spill]]  ;;  %s2270_s13 = smov %s1835_s14 }
 0x806   : > { %s2268_s12 = sld [smem:[#allocation21_spill]] }
 0x807   : > { %s2269_s15 = sld [smem:[#allocation23_spill]] }
 0x80b   : > { %p25_p5 = scmp.ge.s32.totalorder %s2267_s16, 6  }
 0x80c   : > { %s2271_s14 = smov %s2268_s12 }
 0x80d   :  { %27 = sbr.rel (!%p25_p5) target bundleno = 10 (0xa), region = 145 }
 0x812   :  { %1215 = vsyncpa [#allocation5], 1 }
 0x813   :  { %1217 = vsyncpa [#allocation5 + $0x1], 1 }
 0x814   :  { %1218 = vsyncpa [#allocation8], 1 }
 0x815   :  { %1219 = vsyncpa [#allocation11], 1 }
 0x816   :  { %1221 = vsyncpa [#allocation11 + $0x1], 1 }
 0x817   :  { %1222 = vsyncpa [#allocation6], 1 }
 0x818   :  { %1224 = vsyncpa [#allocation6 + $0x1], 1 }
 0x819   :  { %1225 = vsyncpa [#allocation15], 1 }

</bundles_post_ra>
